<compile_context>
chip_gen: v6e
topology: v6e:2x2x1
jax: 0.10.0
libtpu: 0.0.40
codegen_flags: <defaults>
</compile_context>

<pallas_src>
import functools

import jax
import jax.numpy as jnp
from jax.experimental import pallas as pl
from jax.experimental.pallas import tpu as pltpu


def policy_kernel(xt_ref, w1_ref, b1_ref, w2_ref, b2_ref, out_ref):
    # xt:  [D_in, TB]   (batch on lanes -> lane-dense loads/stores)
    # w1:  [H, D_in]     b1: [H, 1]
    # w2:  [D_out, H]    b2: [D_out, 1]
    # out: [D_out, TB]
    xt = xt_ref[...]

    # fc1 + ReLU.  Tiny contractions (K=4 / K=16): single MXU push per tile,
    # overlapped with the pipeline; accumulate in f32.
    h = jnp.dot(w1_ref[...], xt, preferred_element_type=jnp.float32) + b1_ref[...]
    h = jnp.maximum(h, 0.0)

    # fc2
    logits = jnp.dot(w2_ref[...], h, preferred_element_type=jnp.float32) + b2_ref[...]

    # softmax over the feature axis (axis 0 here == dim=1 of the PyTorch module).
    # Per-column (per-lane) math only -> ragged/OOB batch columns cannot
    # contaminate valid ones; their writeback is dropped by Pallas.
    m = jnp.max(logits, axis=0, keepdims=True)
    e = jnp.exp(logits - m)
    denom = jnp.sum(e, axis=0, keepdims=True)
    out_ref[...] = (e * pl.reciprocal(denom, approx=True)).astype(out_ref.dtype)


@functools.partial(jax.jit, static_argnames=("block_b", "out_dtype"))
def policy_forward(x, w1, b1, w2, b2, block_b=512, out_dtype=jnp.float32):
    """x: [B, D_in]; w1: [H, D_in]; b1: [H]; w2: [D_out, H]; b2: [D_out].

    Returns softmax probabilities [B, D_out], matching PyTorch Policy.forward.
    block_b must be a multiple of 128 (prefer a multiple of 256 on v6e/v7x).
    """
    B, d_in = x.shape
    h_dim = w1.shape[0]
    d_out = w2.shape[0]

    n_blocks = pl.cdiv(B, block_b)

    ce = pl.CostEstimate(
        flops=2 * B * (h_dim * d_in + d_out * h_dim),
        transcendentals=B * d_out,
        bytes_accessed=4 * (B * (d_in + d_out) + h_dim * (d_in + 1) + d_out * (h_dim + 1)),
    )

    out_t = pl.pallas_call(
        policy_kernel,
        out_shape=jax.ShapeDtypeStruct((d_out, B), out_dtype),
        grid=(n_blocks,),
        in_specs=[
            pl.BlockSpec((d_in, block_b), lambda i: (0, i)),   # x tile (lane-dense)
            pl.BlockSpec((h_dim, d_in), lambda i: (0, 0)),     # w1 (grid-invariant, VMEM-resident)
            pl.BlockSpec((h_dim, 1), lambda i: (0, 0)),        # b1
            pl.BlockSpec((d_out, h_dim), lambda i: (0, 0)),    # w2
            pl.BlockSpec((d_out, 1), lambda i: (0, 0)),        # b2
        ],
        out_specs=pl.BlockSpec((d_out, block_b), lambda i: (0, i)),
        compiler_params=pltpu.CompilerParams(
            # Megacore / multi-TC split where available; no-op on single-TC chips.
            dimension_semantics=("parallel",),
        ),
        cost_estimate=ce,
    )(x.T, w1, b1.reshape(h_dim, 1), w2, b2.reshape(d_out, 1))

    return out_t.T


def init_params(key, input_size=4, hidden_size=16, output_size=2):
    """PyTorch-style (Kaiming-uniform-ish) init; weights in nn.Linear layout [out, in]."""
    k1, k2, k3, k4 = jax.random.split(key, 4)
    bound1 = 1.0 / jnp.sqrt(input_size)
    bound2 = 1.0 / jnp.sqrt(hidden_size)
    w1 = jax.random.uniform(k1, (hidden_size, input_size), jnp.float32, -bound1, bound1)
    b1 = jax.random.uniform(k2, (hidden_size,), jnp.float32, -bound1, bound1)
    w2 = jax.random.uniform(k3, (output_size, hidden_size), jnp.float32, -bound2, bound2)
    b2 = jax.random.uniform(k4, (output_size,), jnp.float32, -bound2, bound2)
    return w1, b1, w2, b2


if __name__ == "__main__":
    key = jax.random.PRNGKey(0)
    k_x, k_p = jax.random.split(key)

    # Small but multi-block batch (exercises the grid AND the ragged last
    # block: 1000 = 512 + 488 with block_b=512).
    batch, input_size, hidden_size, output_size = 1000, 4, 16, 2
    x = jax.random.normal(k_x, (batch, input_size), jnp.float32)
    w1, b1, w2, b2 = init_params(k_p, input_size, hidden_size, output_size)

    out = policy_forward(x, w1, b1, w2, b2)
    out = jax.block_until_ready(out)

    # pure-JAX reference (same semantics as the PyTorch module)
    h_ref = jnp.maximum(x @ w1.T + b1, 0.0)
    logits_ref = h_ref @ w2.T + b2
    ref = jax.nn.softmax(logits_ref, axis=1)

    assert out.shape == (batch, output_size)
    assert bool(jnp.all(jnp.isfinite(out)))
    assert jnp.allclose(jnp.sum(out, axis=1), 1.0, atol=5e-3)
    assert jnp.allclose(out, ref, atol=5e-3, rtol=5e-3), float(jnp.max(jnp.abs(out - ref)))
    print("KERNEL_OK")
</pallas_src>

<mosaic_0001>
module attributes {stable_mosaic.version = 11 : i64} {
  func.func @policy_kernel(%arg0: i32, %arg1: memref<4x512xf32, #tpu.memory_space<vmem>>, %arg2: memref<16x4xf32, #tpu.memory_space<vmem>>, %arg3: memref<16x1xf32, #tpu.memory_space<vmem>>, %arg4: memref<2x16xf32, #tpu.memory_space<vmem>>, %arg5: memref<2x1xf32, #tpu.memory_space<vmem>>, %arg6: memref<2x512xf32, #tpu.memory_space<vmem>>) attributes {dimension_semantics = [#tpu.dimension_semantics<parallel>], iteration_bounds = array<i64: 2>, scalar_prefetch = 0 : i64, scratch_operands = 0 : i64, tpu.core_type = #tpu.core_type<tc>, window_params = [{transform_indices = @transform_0, window_bounds = array<i64: 4, 512>}, {pipeline_mode = #tpu.pipeline_mode<synchronous>, transform_indices = @transform_1, window_bounds = array<i64: 16, 4>}, {pipeline_mode = #tpu.pipeline_mode<synchronous>, transform_indices = @transform_2, window_bounds = array<i64: 16, 1>}, {pipeline_mode = #tpu.pipeline_mode<synchronous>, transform_indices = @transform_3, window_bounds = array<i64: 2, 16>}, {pipeline_mode = #tpu.pipeline_mode<synchronous>, transform_indices = @transform_4, window_bounds = array<i64: 2, 1>}, {transform_indices = @transform_5, window_bounds = array<i64: 2, 512>}]} {
    %c0 = arith.constant 0 : index
    %c0_0 = arith.constant 0 : index
    %0 = vector.load %arg1[%c0, %c0_0] : memref<4x512xf32, #tpu.memory_space<vmem>>, vector<4x512xf32>
    %c0_1 = arith.constant 0 : index
    %c0_2 = arith.constant 0 : index
    %1 = vector.load %arg2[%c0_1, %c0_2] : memref<16x4xf32, #tpu.memory_space<vmem>>, vector<16x4xf32>
    %cst = arith.constant dense<0.000000e+00> : vector<16x512xf32>
    %2 = tpu.matmul %1, %0, %cst {dimension_numbers = #tpu.dot_dimension_numbers<[1], [0], [0], [1], [0, 0, 1, 1], [], []>} : vector<16x4xf32>, vector<4x512xf32>, vector<16x512xf32> -> vector<16x512xf32>
    %c0_3 = arith.constant 0 : index
    %c0_4 = arith.constant 0 : index
    %3 = vector.load %arg3[%c0_3, %c0_4] : memref<16x1xf32, #tpu.memory_space<vmem>>, vector<16x1xf32>
    %4 = vector.broadcast %3 : vector<16x1xf32> to vector<16x512xf32>
    %5 = arith.addf %2, %4 : vector<16x512xf32>
    %cst_5 = arith.constant 0.000000e+00 : f32
    %6 = vector.broadcast %cst_5 : f32 to vector<16x512xf32>
    %7 = arith.maximumf %5, %6 : vector<16x512xf32>
    %c0_6 = arith.constant 0 : index
    %c0_7 = arith.constant 0 : index
    %8 = vector.load %arg4[%c0_6, %c0_7] : memref<2x16xf32, #tpu.memory_space<vmem>>, vector<2x16xf32>
    %cst_8 = arith.constant dense<0.000000e+00> : vector<2x512xf32>
    %9 = tpu.matmul %8, %7, %cst_8 {dimension_numbers = #tpu.dot_dimension_numbers<[1], [0], [0], [1], [0, 0, 1, 1], [], []>} : vector<2x16xf32>, vector<16x512xf32>, vector<2x512xf32> -> vector<2x512xf32>
    %c0_9 = arith.constant 0 : index
    %c0_10 = arith.constant 0 : index
    %10 = vector.load %arg5[%c0_9, %c0_10] : memref<2x1xf32, #tpu.memory_space<vmem>>, vector<2x1xf32>
    %11 = vector.broadcast %10 : vector<2x1xf32> to vector<2x512xf32>
    %12 = arith.addf %9, %11 : vector<2x512xf32>
    %cst_11 = arith.constant dense<0xFF800000> : vector<512xf32>
    %13 = vector.multi_reduction <maximumf>, %12, %cst_11 [0] : vector<2x512xf32> to vector<512xf32>
    %14 = vector.shape_cast %13 : vector<512xf32> to vector<1x512xf32>
    %15 = vector.broadcast %14 : vector<1x512xf32> to vector<2x512xf32>
    %16 = arith.subf %12, %15 : vector<2x512xf32>
    %17 = math.exp %16 : vector<2x512xf32>
    %cst_12 = arith.constant dense<0.000000e+00> : vector<512xf32>
    %18 = vector.multi_reduction <add>, %17, %cst_12 [0] : vector<2x512xf32> to vector<512xf32>
    %19 = vector.shape_cast %18 : vector<512xf32> to vector<1x512xf32>
    %20 = tpu.reciprocal %19 {approx = true} : vector<1x512xf32> -> vector<1x512xf32>
    %21 = vector.broadcast %20 : vector<1x512xf32> to vector<2x512xf32>
    %22 = arith.mulf %17, %21 : vector<2x512xf32>
    %c0_13 = arith.constant 0 : index
    %c0_14 = arith.constant 0 : index
    %23 = vector.load %arg6[%c0_13, %c0_14] : memref<2x512xf32, #tpu.memory_space<vmem>>, vector<2x512xf32>
    tpu.vector_store %arg6[%c0_13, %c0_14], %22 {strides = array<i32>} : memref<2x512xf32, #tpu.memory_space<vmem>>, vector<2x512xf32>,
    return
  }
  func.func @transform_0(%arg0: i32) -> (i32, i32) {
    %c0_i32 = arith.constant 0 : i32
    %c0_i32_0 = arith.constant 0 : i32
    return %c0_i32, %arg0 : i32, i32
  }
  func.func @transform_1(%arg0: i32) -> (i32, i32) {
    %c0_i32 = arith.constant 0 : i32
    %c0_i32_0 = arith.constant 0 : i32
    %c0_i32_1 = arith.constant 0 : i32
    return %c0_i32, %c0_i32_0 : i32, i32
  }
  func.func @transform_2(%arg0: i32) -> (i32, i32) {
    %c0_i32 = arith.constant 0 : i32
    %c0_i32_0 = arith.constant 0 : i32
    %c0_i32_1 = arith.constant 0 : i32
    return %c0_i32, %c0_i32_0 : i32, i32
  }
  func.func @transform_3(%arg0: i32) -> (i32, i32) {
    %c0_i32 = arith.constant 0 : i32
    %c0_i32_0 = arith.constant 0 : i32
    %c0_i32_1 = arith.constant 0 : i32
    return %c0_i32, %c0_i32_0 : i32, i32
  }
  func.func @transform_4(%arg0: i32) -> (i32, i32) {
    %c0_i32 = arith.constant 0 : i32
    %c0_i32_0 = arith.constant 0 : i32
    %c0_i32_1 = arith.constant 0 : i32
    return %c0_i32, %c0_i32_0 : i32, i32
  }
  func.func @transform_5(%arg0: i32) -> (i32, i32) {
    %c0_i32 = arith.constant 0 : i32
    %c0_i32_0 = arith.constant 0 : i32
    return %c0_i32, %arg0 : i32, i32
  }
}

</mosaic_0001>

<bundles_post_ra>
// kernel: policy_forward.1
= control target key start
LH: loop header
LB: loop body
LE: loop exit
PB: predicated region body
PF: predicated region fallthrough
CT: control target
= control target key end

     0   :  { %10 = vsyncpa [#allocation3], 0  ;;  %s1044_s0 = inlined_call_operand.vmem [shape: f32[4,1000], index: 0, kind: input, shape index: {}]   ;;  %s1045_s1 = inlined_call_operand.vmem [shape: f32[16,4], index: 1, kind: input, shape index: {}]   ;;  %s1046_s2 = inlined_call_operand.vmem [shape: f32[16,1], index: 2, kind: input, shape index: {}]   ;;  %s1047_s3 = inlined_call_operand.vmem [shape: f32[2,16], index: 3, kind: input, shape index: {}]   ;;  %s1048_s4 = inlined_call_operand.vmem [shape: f32[2,1], index: 4, kind: input, shape index: {}]   ;;  %s1049_s5 = inlined_call_operand.hbm [shape: f32[2,1000], index: 5, kind: output, shape index: {}]  }
   0x1   :  { %12 = vsyncpa [#allocation3 + $0x1], 0  ;;  %s932_s18 = smov 0   ;;  %s934_s19 = smov 0  }
   0x2   :  { %s936_s20 = smov 0   ;;  %s938_s21 = smov 0  }
   0x3 LB: > { %s953_s22 = sadd.s32 4294967295, %s896_s21   ;;  %s751_s23 = sadd.s32 4294967294, %s896_s21   ;;  %s896_s21 = sphi %s938_s21, %s1055_s21   ;;  %s892_s20 = sphi %s936_s20, %s1054_s20   ;;  %s888_s19 = sphi %s934_s19, %s1053_s19   ;;  %s884_s18 = sphi %s932_s18, %s1052_s18  }
   0x4   : > { %s957_s24 = sadd.s32 1, %s896_s21   ;;  %s135_s25 = sadd.s32 1, %s892_s20 }
   0x5   : > { %s132_s26 = ssub.s32 %s896_s21, %s957_s24  ;;  %p145_p0 = scmp.ne.s32.totalorder %s892_s20, %s888_s19 }
   0x6   : > { %p133_p1 = scmp.eq.s32.totalorder %s132_s26, 0  ;;  %p146_p2 = scmp.eq.s32.totalorder %s953_s22, 1 }
   0x7   : > { %p151_p3 = scmp.ne.s32.totalorder %s888_s19, %s884_s18  ;;  %p152_p4 = scmp.eq.s32.totalorder %s751_s23, 1 }
   0x8   : > { %s968_s27 = scalar_select %p133_p1, %s892_s20, %s135_s25  }
   0x9   : > { %p970_p5 = por %p146_p2, %p145_p0  ;;  %p974_p6 = por %p152_p4, %p151_p3 }
   0xa   : > { %p754_p7 = scmp.ge.s32.totalorder %s896_s21, 1  ;;  %p191_p8 = scmp.lt.s32.totalorder %s896_s21, 3 }
   0xc   : > { %p192_p9 = pnand %p754_p7, %p191_p8 }
   0xd   : > { %s756_s30 = sshll.u32 (!%p192_p9), %s953_s22, 2  ;;  %s216_s6 = sand.u32 (!%p192_p9), 1, %s888_s19  }
   0xe   : > { %195 = sbr.rel (%p192_p9) target bundleno = 511 (0x1ff), region = 40  ;;  %p220_p10 = scmp.lt.s32.totalorder (!%p192_p9), %s756_s30, 7 }
   0xf   : > { %s755_s7 = sshll.u32 (!%p192_p9), %s216_s6, 3  ;;  %s773_s8 = sshll.u32 (!%p192_p9), %s953_s22, 7 }
  0x10   : > { %s218_s9 = scalar_lea.vmem (!%p192_p9), [#allocation2], %s755_s7  ;;  %s678_s14 = scalar_lea.sflag (!%p192_p9), [#allocation3], %s216_s6 }
  0x11   : > { %s901_s16 = smov (!%p192_p9), [#allocation2]  }
  0x12   : > { %s840_s17 = sshll.u32 (!%p192_p9), %s901_s16, 4  ;;  %s841_s17 = int_to_ptr.vmem [resolvable:$false] %s840_s17 }
  0x13   : > { %v898_v0 = vmov 0.0   ;;  %v231_v1 = vld [vmem:[%s1046_s2 + $0x8] sm:$0xff]  ;;  %v899_v2 = vmov 0   ;;  %s1057_s30 = smov (!%p220_p10, %s756_s30), 7  ;;  %v230_v3 = vld [vmem:[%s1046_s2] sm:$0xff]  ;;  %vm253_vm0 = vcmask 1043456  }
  0x14   : > { %326 = vmatprep.mubr.f32.mxu0 %v898_v0  ;;  %403 = vmatprep.mubr.f32.mxu1 %v898_v0  ;;  %s757_s10 = sshll.u32 %s1057_s30, 2  ;;  %v228_v8 = vld [vmem:[%s1045_s1] sm:$0xff]  ;;  %vm246_vm1 = vcmask 31744   ;;  %v229_v9 = vld [vmem:[%s1045_s1 + $0x8] sm:$0xff]  ;;  %vm431_vm2 = vcmask 130048   ;;  %vm577_vm3 = vcmask 1041408  }
  0x15   : > { %816 = vset.pattern.permute.xlu0 %v899_v2  ;;  %817 = vset.pattern.permute.xlu1 %v899_v2  ;;  %s223_s13 = scalar_lea.vmem %s1044_s0, %s757_s10  ;;  %v425_v10 = vld [vmem:[%s1048_s4] sm:$0x3]  ;;  %s692_s10 = sshll.u32 %s218_s9, 4  ;;  %s693_s10 = int_to_ptr.vmem [resolvable:$true] %s692_s10 }
  0x16   : > { %239 = vperm.xlu0 %816, %v231_v1   ;;  %v226_v4 = vld [vmem:[%s223_s13] sm:$0xff]  ;;  %v227_v5 = vld [vmem:[%s223_s13 + $0x8] sm:$0xff]  ;;  %428 = vperm.xlu1 %817, %v425_v10   ;;  %s690_s13 = scalar_lea.hbm %s1049_s5, %s773_s8  ;;  %s836_s15 = scalar_lea.vmem %s693_s10, 128 }
  0x17   : > { %v244_v6 = vcombine.high %v226_v4, %v226_v4  ;;  %v245_v7 = vcombine.high %v227_v5, %v227_v5  ;;  %v424_v37 = vld [vmem:[%s1047_s3] sm:$0x3]  ;;  %p837_p11 = scmp.ne.s32.totalorder %s693_s10, %s836_s15  ;;  %s842_s22 = scalar_lea.vmem %s841_s17, 256 }
  0x18   : > { %p843_p0 = scmp.lt.s32.totalorder %s693_s10, %s841_s17  ;;  %p844_p1 = scmp.lt.s32.totalorder %s842_s22, %s836_s15 }
  0x19   : > { %758 = vmatprep.subr.msk.mxu0 %vm253_vm0, %v244_v6  ;;  %762 = vmatprep.subr.msk.mxu1 %vm253_vm0, %v245_v7  ;;  %p838_p12 = pnand %p837_p11, %p970_p5 }
  0x1a   : > { %234 = vperm.xlu0 %816, %v230_v3   ;;  %759 = vmatpush1.msk.msra.mxu0 %vm253_vm0, %v226_v4  ;;  %p845_p2 = por %p844_p1, %p843_p0 }
  0x1b   : > { %763 = vmatpush1.msk.msra.mxu1 %vm253_vm0, %v227_v5  ;;  %760 = vmatmul.mubr.msk.f32.vlgmr.msra.gmra.mxu0 %vm246_vm1, %v228_v8  ;;  %p839_p13 = pneg %p838_p12 }
  0x1c   : > { %764 = vmatmul.mubr.msk.f32.vlgmr.msra.gmra.mxu1 %vm246_vm1, %v228_v8  ;;  %332 = vmatprep.mubr.f32.mxu0 %v898_v0 }
  0x1d   : > { %409 = vmatprep.mubr.f32.mxu1 %v898_v0  ;;  %p846_p3 = pnand %p845_p2, %p839_p13 }
  0x1f   : > { %761 = vmatmul.mubr.msk.f32.gmra.mxu0 %vm246_vm1, %v229_v9 }
  0x20   : > { %765 = vmatmul.mubr.msk.f32.gmra.mxu1 %vm246_vm1, %v229_v9  ;;  %499 = vmatprep.mubr.f32.mxu0 %v898_v0 }
  0x21   : > { %570 = vmatprep.mubr.f32.mxu1 %v898_v0 }
  0x91   : > { %v240_v11 = vpop.permute.xlu0 %239  ;;  %v429_v38 = vpop.permute.xlu1 %428 }
  0x95   : > { %v235_v18 = vpop.permute.xlu0 %234 }
  0xdb   : > { %v328_v12 = vpop.f32.mrf.mxu0 }
  0xdc   : > { %v405_v13 = vpop.f32.mrf.mxu1  ;;  %v329_v27 = vadd.f32 %v328_v12, %v235_v18 }
  0xdd   : > { %v330_v14 = vpop.f32.mrf.mxu0  ;;  %v406_v28 = vadd.f32 %v405_v13, %v235_v18 }
  0xde   : > { %v407_v15 = vpop.f32.mrf.mxu1  ;;  %v331_v23 = vadd.f32 %v330_v14, %v235_v18  ;;  %v416_v35 = vmax.f32 %v329_v27, 0.0 }
  0xdf   : > { %v334_v16 = vpop.f32.mrf.mxu0  ;;  %v408_v24 = vadd.f32 %v407_v15, %v235_v18  ;;  %v418_v36 = vmax.f32 %v406_v28, 0.0 }
  0xe0   : > { %v411_v17 = vpop.f32.mrf.mxu1  ;;  %v335_v19 = vadd.f32 %v334_v16, %v240_v11  ;;  %v417_v33 = vmax.f32 %v331_v23, 0.0 }
  0xe1   : > { %v412_v20 = vadd.f32 %v411_v17, %v240_v11  ;;  %v336_v21 = vpop.f32.mrf.mxu0  ;;  %v419_v34 = vmax.f32 %v408_v24, 0.0 }
  0xe2   : > { %v413_v22 = vpop.f32.mrf.mxu1  ;;  %v337_v25 = vadd.f32 %v336_v21, %v240_v11  ;;  %v420_v31 = vmax.f32 %v335_v19, 0.0 }
  0xe3   : > { %v414_v26 = vadd.f32 %v413_v22, %v240_v11  ;;  %v422_v32 = vmax.f32 %v412_v20, 0.0 }
  0xe4   : > { %v421_v29 = vmax.f32 %v337_v25, 0.0 }
  0xe5   : > { %v423_v30 = vmax.f32 %v414_v26, 0.0 }
  0xe6   : > { %463 = vmatprep.subr.mxu0 %v421_v29 }
  0xe7   : > { %534 = vmatprep.subr.mxu1 %v423_v30  ;;  %464 = vmatpush1.msra.mxu0 %v420_v31 }
  0xe8   : > { %535 = vmatpush1.msra.mxu1 %v422_v32  ;;  %465 = vmatprep.subr.mxu0 %v417_v33 }
  0xe9   : > { %536 = vmatprep.subr.mxu1 %v419_v34  ;;  %466 = vmatpush1.msra.mxu0 %v416_v35 }
  0xea   : > { %537 = vmatpush1.msra.mxu1 %v418_v36  ;;  %766 = vmatmul.mubr.msk.f32.vlgmr.msra.gmra.mxu0 %vm431_vm2, %v424_v37 }
  0xeb   : > { %767 = vmatmul.mubr.msk.f32.vlgmr.msra.gmra.mxu1 %vm431_vm2, %v424_v37 }
 0x1aa   : > { %v501_v39 = vpop.f32.mrf.mxu0 }
 0x1ab   : > { %v572_v40 = vpop.f32.mrf.mxu1  ;;  %v502_v41 = vadd.f32 %v501_v39, %v429_v38 }
 0x1ac   : > { %v573_v42 = vadd.f32 %v572_v40, %v429_v38  ;;  %v503_v43 = vpop.f32.mrf.mxu0 }
 0x1ad   : > { %v574_v44 = vpop.f32.mrf.mxu1  ;;  %v578_v45 = vsel %vm577_vm3, %v502_v41, -inf  ;;  %v504_v47 = vadd.f32 %v503_v43, %v429_v38 }
 0x1ae   : > { %v592_v46 = vsel %vm577_vm3, %v573_v42, -inf  ;;  %v575_v48 = vadd.f32 %v574_v44, %v429_v38  ;;  %v579_v49 = vrot.slane %v578_v45, 4 }
 0x1af   : > { %v593_v50 = vrot.slane %v592_v46, 4  ;;  %v585_v51 = vsel %vm577_vm3, %v504_v47, -inf }
 0x1b0   : > { %v599_v52 = vsel %vm577_vm3, %v575_v48, -inf  ;;  %v580_v53 = vmax.f32 %v578_v45, %v579_v49  ;;  %v586_v55 = vrot.slane %v585_v51, 4 }
 0x1b1   : > { %v594_v54 = vmax.f32 %v592_v46, %v593_v50  ;;  %v600_v56 = vrot.slane %v599_v52, 4 }
 0x1b2   : > { %v581_v57 = vrot.slane %v580_v53, 2  ;;  %v587_v59 = vmax.f32 %v585_v51, %v586_v55  ;;  %v900_v51 = vmov 1983009808  }
 0x1b3   : > { %v595_v58 = vrot.slane %v594_v54, 2  ;;  %v601_v60 = vmax.f32 %v599_v52, %v600_v56  ;;  %v661_v52 = vunpack.c.l.s4 %v900_v51 }
 0x1b4   : > { %v582_v61 = vmax.f32 %v580_v53, %v581_v57  ;;  %v588_v63 = vrot.slane %v587_v59, 2  ;;  %v663_v53 = vlaneseq }
 0x1b5   : > { %v596_v62 = vmax.f32 %v594_v54, %v595_v58  ;;  %v602_v0 = vrot.slane %v601_v60, 2  ;;  %v662_v54 = vunpack.c.0.s8 %v661_v52 }
 0x1b6   : > { %v583_v1 = vrot.slane %v582_v61, 1  ;;  %v589_v3 = vmax.f32 %v587_v59, %v588_v63  ;;  %v664_v55 = vshrl.u32 %v663_v53, 7 }
 0x1b7   : > { %v597_v2 = vrot.slane %v596_v62, 1  ;;  %v603_v4 = vmax.f32 %v601_v60, %v602_v0 }
 0x1b8   : > { %v584_v5 = vmax.f32 %v582_v61, %v583_v1  ;;  %v590_v7 = vrot.slane %v589_v3, 1 }
 0x1b9   : > { %v598_v6 = vmax.f32 %v596_v62, %v597_v2  ;;  %v604_v8 = vrot.slane %v603_v4, 1  ;;  %v665_v62 = vsub.s32 %v662_v54, %v664_v55 }
 0x1ba   : > { %v606_v9 = vsub.f32 %v502_v41, %v584_v5  ;;  %v591_v11 = vmax.f32 %v589_v3, %v590_v7 }
 0x1bb   : > { %v608_v10 = vsub.f32 %v573_v42, %v598_v6  ;;  %v605_v12 = vmax.f32 %v603_v4, %v604_v8 }
 0x1bc   : > { %v610_v13 = vmul.f32 1.442695, %v606_v9  ;;  %v607_v15 = vsub.f32 %v504_v47, %v591_v11 }
 0x1bd   : > { %v614_v14 = vmul.f32 1.442695, %v608_v10  ;;  %v609_v16 = vsub.f32 %v575_v48, %v605_v12 }
 0x1be   : > { %820 = vpow2.f32 %v610_v13  ;;  %v612_v17 = vmul.f32 1.442695, %v607_v15 }
 0x1bf   : > { %v616_v18 = vmul.f32 1.442695, %v609_v16  ;;  %822 = vpow2.f32 %v614_v14 }
 0x1c0   : > { %824 = vpow2.f32 %v612_v17 }
 0x1c1   : > { %826 = vpow2.f32 %v616_v18 }
 0x1cb   : > { %v821_v19 = vpop.eup %820 }
 0x1cc   : > { %v823_v20 = vpop.eup %822  ;;  %v618_v21 = vsel %vm577_vm3, %v821_v19, 0.0 }
 0x1cd   : > { %v825_v22 = vpop.eup %824  ;;  %v619_v23 = vrot.slane %v618_v21, 4  ;;  %v632_v24 = vsel %vm577_vm3, %v823_v20, 0.0 }
 0x1ce   : > { %v827_v25 = vpop.eup %826  ;;  %v633_v26 = vrot.slane %v632_v24, 4  ;;  %v625_v27 = vsel %vm577_vm3, %v825_v22, 0.0 }
 0x1cf   : > { %v620_v28 = vadd.f32 %v619_v23, %v618_v21  ;;  %v626_v29 = vrot.slane %v625_v27, 4  ;;  %v639_v30 = vsel %vm577_vm3, %v827_v25, 0.0 }
 0x1d0   : > { %v634_v31 = vadd.f32 %v633_v26, %v632_v24  ;;  %v640_v32 = vrot.slane %v639_v30, 4 }
 0x1d1   : > { %v621_v33 = vrot.slane %v620_v28, 2  ;;  %v627_v34 = vadd.f32 %v626_v29, %v625_v27 }
 0x1d2   : > { %v635_v35 = vrot.slane %v634_v31, 2  ;;  %v641_v36 = vadd.f32 %v640_v32, %v639_v30 }
 0x1d3   : > { %v622_v37 = vadd.f32 %v621_v33, %v620_v28  ;;  %v628_v38 = vrot.slane %v627_v34, 2 }
 0x1d4   : > { %v636_v39 = vadd.f32 %v635_v35, %v634_v31  ;;  %v642_v40 = vrot.slane %v641_v36, 2 }
 0x1d5   : > { %v623_v41 = vrot.slane %v622_v37, 1  ;;  %v629_v42 = vadd.f32 %v628_v38, %v627_v34 }
 0x1d6   : > { %v637_v43 = vrot.slane %v636_v39, 1  ;;  %v643_v44 = vadd.f32 %v642_v40, %v641_v36 }
 0x1d7   : > { %v624_v45 = vadd.f32 %v623_v41, %v622_v37  ;;  %v630_v46 = vrot.slane %v629_v42, 1 }
 0x1d8   : > { %v638_v47 = vadd.f32 %v637_v43, %v636_v39  ;;  %v644_v48 = vrot.slane %v643_v44, 1 }
 0x1d9   : > { %828 = vrcp.f32 %v624_v45  ;;  %v631_v49 = vadd.f32 %v630_v46, %v629_v42 }
 0x1da   : > { %830 = vrcp.f32 %v638_v47  ;;  %v645_v50 = vadd.f32 %v644_v48, %v643_v44 }
 0x1db   : > { %832 = vrcp.f32 %v631_v49 }
 0x1dc   : > { %834 = vrcp.f32 %v645_v50 }
 0x1e6   : > { %v829_v56 = vpop.eup %828 }
 0x1e7   : > { %v831_v57 = vpop.eup %830  ;;  %v650_v60 = vmul.f32 %v829_v56, %v821_v19 }
 0x1e8   : > { %v833_v58 = vpop.eup %832  ;;  %v652_v63 = vmul.f32 %v831_v57, %v823_v20 }
 0x1e9   : > { %v835_v59 = vpop.eup %834  ;;  %v651_v61 = vmul.f32 %v833_v58, %v825_v22 }
 0x1ea   : > { %v653_v0 = vmul.f32 %v835_v59, %v827_v25 }
 0x1eb   : > { %v658_v1 = vcombine.low %v650_v60, %v651_v61 }
 0x1ec   : > { %v659_v2 = vcombine.low %v652_v63, %v653_v0 }
 0x1ed   : > { %v666_v3 = vrot.slane %v658_v1, %v665_v62 }
 0x1ee   : > { %v673_v4 = vrot.slane %v659_v2, %v665_v62 }
 0x1f0   : > { %v674_v5 = vcombine.low %v666_v3, %v673_v4 }
 0x1f2   : > { %676 = vst [vmem:[%s218_s9] sm:$0xff] %v674_v5 }
 0x1f3   : > { %849 = shalt.err (!%p846_p3)
}
 0x1f4   : > { %s850_s23 = scalar_lea.hbm %s690_s13, 128  ;;  %s854_s30 = scalar_lea.hbm %s1049_s5, 256 }
 0x1f5   : > { %p851_p4 = scmp.ne.s32.totalorder %s690_s13, %s850_s23  ;;  %p855_p9 = scmp.lt.s32.totalorder %s690_s13, %s1049_s5 }
 0x1f6   : > { %p856_p10 = scmp.lt.s32.totalorder %s854_s30, %s850_s23 }
 0x1f7   : > { %p852_p7 = pnand %p851_p4, %p970_p5 }
 0x1f8   : > { %p857_p11 = por %p856_p10, %p855_p9 }
 0x1f9   : > { %p853_p8 = pneg %p852_p7 }
 0x1fb   : > { %p858_p12 = pnand %p857_p11, %p853_p8 }
 0x1fd   : > { %861 = shalt.err (!%p858_p12)
}
 0x1fe   : > { %774 = dma.vmem_to_hbm [thread:$0]  (%p970_p5), %s693_s10, 128, %s690_s13, %s678_s14  }
 0x1ff PF: > { %p780_p13 = scmp.ge.s32.totalorder %s896_s21, 2  ;;  %s704_s8 = sand.u32 1, %s884_s18  }
 0x200   : > { %s705_s9 = scalar_lea.sflag [#allocation3], %s704_s8 }
 0x201   : > { %p777_p0 = pnand %p780_p13, %p974_p6 }
 0x203   : > { %p778_p1 = pneg %p777_p0 }
 0x205   : > { %879 = dma.done.wait (%p778_p1), %s705_s9, 128  }
 0x206   : > { %881 = vsyncadd (%p778_p1), %s705_s9, 4294967168  ;;  %p15_p2 = scmp.ge.s32.totalorder %s957_s24, 4   ;;  %s1052_s18 = smov %s888_s19 }
 0x207   : > { %s1053_s19 = smov %s892_s20  ;;  %s1054_s20 = smov %s968_s27 }
 0x208   : > { %s1055_s21 = smov %s957_s24  ;;  %17 = sbr.rel (!%p15_p2) target bundleno = 3 (0x3), region = 75 }
 0x20d   :  { %710 = vsyncpa [#allocation3], 1 }
 0x20e   :  { %712 = vsyncpa [#allocation3 + $0x1], 1 }

</bundles_post_ra>
